<compile_context>
chip_gen: v6e
topology: v6e:2x2x1
jax: 0.10.0
libtpu: 0.0.40
codegen_flags: <defaults>
</compile_context>

<pallas_src>
import functools

import numpy as np
import jax
import jax.numpy as jnp
from jax.experimental import pallas as pl
from jax.experimental.pallas import tpu as pltpu

_LANE = 128


# ----------------------------------------------------------------------------
# Pallas kernel: sum of squared differences (MSE numerator).
#   grid = (num_cores, steps)  — axis 0 "parallel" (v7x megacore), axis 1
#   "arbitrary" (reduction).  Output block (8, 128) per core holds per-(sublane,
#   lane) partials; the tiny final reduce happens in the wrapper.
# ----------------------------------------------------------------------------
def _mse_sum_kernel(a_ref, b_ref, out_ref, *, block_rows, valid_rows, need_mask):
    step = pl.program_id(1)

    @pl.when(step == 0)
    def _():
        out_ref[...] = jnp.zeros_like(out_ref)

    # Read in native dtype, upcast in-register.
    d = a_ref[...].astype(jnp.float32) - b_ref[...].astype(jnp.float32)

    if need_mask:  # compile-time Python bool: only emitted when rows don't divide
        blk = pl.program_id(0) * pl.num_programs(1) + step          # unclamped block id
        row0 = blk * block_rows
        rid = jax.lax.broadcasted_iota(jnp.int32, (block_rows, 1), 0) + row0
        # where-select kills any OOB garbage (incl. NaN/Inf) before squaring.
        d = jnp.where(rid < valid_rows, d, 0.0)

    sq = d * d
    # (block_rows,128) -> (block_rows//8, 8, 128): splits the sublane axis only
    # (trailing (8,128) vreg tile preserved, no relayout).  The axis-0 sum is
    # pure cross-vreg VALU adds — no XLU cross-sublane/lane reduce and a full
    # unmasked vreg accumulate/store in the hot loop.
    out_ref[...] += jnp.sum(sq.reshape(block_rows // 8, 8, _LANE), axis=0)


def mse_mean_pallas(a, b, block_bytes=4 * 1024 * 1024):
    """mean((a - b) ** 2) over all elements, via a Pallas streaming reduction."""
    assert a.shape == b.shape
    n = int(np.prod(a.shape))
    if n == 0:
        return jnp.float32(0.0)

    isa = np.dtype(a.dtype).itemsize
    isb = np.dtype(b.dtype).itemsize
    # Sublane packing requirement over BOTH input dtypes (8 f32 / 16 bf16 / 32 i8).
    pack = max(8, 32 // min(isa, isb))

    a_flat = a.reshape(-1)
    b_flat = b.reshape(-1)

    rows = n // _LANE
    rem = n % _LANE
    tail = jnp.float32(0.0)
    if rem:
        # Rare ragged lane tail (<128 elems): tiny jnp reduce, no full-tensor pad.
        td = a_flat[rows * _LANE:].astype(jnp.float32) - b_flat[rows * _LANE:].astype(jnp.float32)
        tail = jnp.sum(td * td)
        # NOTE: only in this rare case does the main-body slice below copy; for
        # the usual numel % 128 == 0 inputs the reshape is free (no copy).
        a_flat = a_flat[: rows * _LANE]
        b_flat = b_flat[: rows * _LANE]

    if rows < pack:
        # Tiny input: a pallas_call costs more than the compute itself.
        d = a_flat.astype(jnp.float32) - b_flat.astype(jnp.float32)
        return (jnp.sum(d * d) + tail) / jnp.float32(n)

    a2 = a_flat.reshape(rows, _LANE)
    b2 = b_flat.reshape(rows, _LANE)

    # Dtype-aware block size: ~block_bytes per (larger-dtype) input buffer.
    # 2 inputs x 2 pipeline buffers x 4 MiB = 16 MiB, covered by the 32 MiB
    # vmem_limit below on all of v5e / v6e / v7x.
    budget_rows = max(pack, block_bytes // (_LANE * max(isa, isb)))
    block_rows = min(budget_rows, rows)
    block_rows = max(pack, (block_rows // pack) * pack)

    total_blocks = -(-rows // block_rows)
    num_cores = 2 if total_blocks >= 2 else 1   # leading "parallel" axis (v7x megacore)
    steps = -(-total_blocks // num_cores)
    covered = num_cores * steps * block_rows
    need_mask = covered != rows                 # partial last block and/or duplicated block
    last_blk = total_blocks - 1

    def in_map(c, i):
        # Clamp so a duplicated overflow step re-reads the last block; the
        # in-kernel row mask (driven by the UNclamped block id) zeroes it out.
        return (jnp.minimum(c * steps + i, last_blk), 0)

    kernel = functools.partial(
        _mse_sum_kernel,
        block_rows=block_rows,
        valid_rows=rows,
        need_mask=need_mask,
    )

    out = pl.pallas_call(
        kernel,
        out_shape=jax.ShapeDtypeStruct((num_cores, 8, _LANE), jnp.float32),
        grid=(num_cores, steps),
        in_specs=[
            pl.BlockSpec((block_rows, _LANE), in_map),
            pl.BlockSpec((block_rows, _LANE), in_map),
        ],
        out_specs=pl.BlockSpec((None, 8, _LANE), lambda c, i: (c, 0, 0)),
        compiler_params=pltpu.CompilerParams(
            dimension_semantics=("parallel", "arbitrary"),
            vmem_limit_bytes=32 * 1024 * 1024,
        ),
        cost_estimate=pl.CostEstimate(
            flops=3 * rows * _LANE,
            transcendentals=0,
            bytes_accessed=rows * _LANE * (isa + isb) + num_cores * 8 * _LANE * 4,
        ),
    )(a2, b2)

    # One tiny XLA reduce over the (num_cores, 8, 128) partials.
    return (jnp.sum(out) + tail) / jnp.float32(n)


# ----------------------------------------------------------------------------
# Signed sum of squared top-k barcode lengths (tens of elements) — plain jnp;
# a dedicated pallas_call would cost more than the compute itself.
#   bars: [N, K] f32 (row = one (batch, idx, homology-dim) slot, sorted desc.)
#   beta: [N]    i32 (Betti number; first `beta` bars get sign -1)
# ----------------------------------------------------------------------------
def topo_signed_sum(bars, beta):
    k_idx = jnp.arange(bars.shape[1], dtype=jnp.int32)[None, :]
    signs = jnp.where(k_idx < beta[:, None], jnp.float32(-1.0), jnp.float32(1.0))
    return jnp.sum(signs * bars * bars)


# ----------------------------------------------------------------------------
# Host-side persistence (LevelSetLayer2D stand-in): dim-0 bars of the
# superlevel-set filtration (sublevel=False) on the Freudenthal-triangulated
# grid, via union-find over vertices processed in decreasing value order.
# ----------------------------------------------------------------------------
def _superlevel_dim0_bar_lengths(img):
    H, W = img.shape
    f = np.asarray(img, dtype=np.float64).ravel()
    order = np.argsort(-f, kind="stable")
    parent = np.full(H * W, -1, dtype=np.int64)
    birth = np.zeros(H * W, dtype=np.float64)
    lengths = []
    # Freudenthal triangulation edges: axis neighbors + one diagonal direction
    nbrs = ((-1, 0), (1, 0), (0, -1), (0, 1), (1, 1), (-1, -1))

    def find(x):
        while parent[x] != x:
            parent[x] = parent[parent[x]]
            x = parent[x]
        return x

    for v in order:
        v = int(v)
        parent[v] = v
        birth[v] = f[v]
        r, c = divmod(v, W)
        for dr, dc in nbrs:
            rr, cc = r + dr, c + dc
            if 0 <= rr < H and 0 <= cc < W:
                u = rr * W + cc
                if parent[u] != -1:
                    ru, rv = find(u), find(v)
                    if ru != rv:
                        if birth[ru] >= birth[rv]:
                            lengths.append(birth[rv] - f[v])
                            parent[rv] = ru
                        else:
                            lengths.append(birth[ru] - f[v])
                            parent[ru] = rv
    # The essential (infinite) bar has length 0 in TopKBarcodeLengths semantics.
    return np.asarray(lengths, dtype=np.float32)


def _topk_pad(lengths, k):
    out = np.zeros(k, dtype=np.float32)
    if lengths.size:
        ls = np.sort(lengths)[::-1][:k]
        out[: ls.size] = ls
    return out


# ----------------------------------------------------------------------------
# TopoLoss forward
# ----------------------------------------------------------------------------
def topo_loss_forward(y_pred, y_raw, topo_label, idx=(1,),
                      topo_weight=1.0, sqdiff_weight=10.0, max_k=20):
    """
    y_pred, y_raw: [B, C, H, W] float (NCHW, like the PyTorch module)
    topo_label:    [B, C, 2]    int32 (beta_0, beta_1 per class)
    """
    B, C, H, W = y_pred.shape
    idx = tuple(idx)

    # Dispatch the (small) channel slice needed by the host persistence pass,
    # then the MSE Pallas kernel.  Both dispatches are async; the slice runs
    # first, so the host union-find below overlaps the device MSE kernel, and
    # only |idx| channels (not the full NCHW tensor) cross the D2H link.
    # Channel offset i+1 matches the reference `y_pred[b, idx + 1, ...]`.
    ch = jnp.asarray([i + 1 for i in idx], dtype=jnp.int32)
    pred_slice = jnp.take(y_pred, ch, axis=1)                                    # [B,|idx|,H,W]
    label_slice = jnp.take(topo_label, jnp.asarray(idx, dtype=jnp.int32), axis=1)  # [B,|idx|,2]
    l_sqdiff = mse_mean_pallas(y_raw, y_pred)                                    # Pallas kernel

    pred_np = np.asarray(jax.device_get(pred_slice))
    label_np = np.asarray(jax.device_get(label_slice))

    bars_rows, beta_rows = [], []
    for j, _ in enumerate(idx):
        for b in range(B):
            d0 = _topk_pad(_superlevel_dim0_bar_lengths(pred_np[b, j]), max_k)
            # TODO(synk): dim-1 persistence bars (holes) not computed; zeros used.
            d1 = np.zeros(max_k, dtype=np.float32)
            bars_rows.append(d0)
            bars_rows.append(d1)
            beta_rows.append(int(label_np[b, j, 0]))
            beta_rows.append(int(label_np[b, j, 1]))

    bars = jnp.asarray(np.stack(bars_rows, axis=0), dtype=jnp.float32)  # [B*|idx|*2, K]
    beta = jnp.asarray(np.asarray(beta_rows, dtype=np.int32))           # [B*|idx|*2]

    topo_sum = topo_signed_sum(bars, beta)              # sum over idx, batch of (l0 + l1)
    l_topo_over_idx = topo_sum / jnp.float32(B * len(idx))
    return jnp.float32(topo_weight) * l_topo_over_idx + jnp.float32(sqdiff_weight) * l_sqdiff


if __name__ == "__main__":
    key = jax.random.PRNGKey(0)
    B, C, H, W = 2, 4, 16, 16
    k1, k2, k3, k4, k5 = jax.random.split(key, 5)
    y_pred = jax.nn.sigmoid(jax.random.normal(k1, (B, C, H, W), dtype=jnp.float32))
    y_raw = jax.nn.sigmoid(jax.random.normal(k2, (B, C, H, W), dtype=jnp.float32))
    topo_label = jax.random.randint(k3, (B, C, 2), 1, 4).astype(jnp.int32)

    loss = topo_loss_forward(y_pred, y_raw, topo_label, idx=(1,))
    loss = jax.block_until_ready(loss)
    assert np.isfinite(float(loss))

    def _check_mse(a, b, block_bytes, rtol):
        ref = float(jnp.mean((a.astype(jnp.float32) - b.astype(jnp.float32)) ** 2))
        got = float(jax.block_until_ready(mse_mean_pallas(a, b, block_bytes=block_bytes)))
        assert abs(ref - got) <= rtol * max(1.0, abs(ref)), (ref, got)

    # 1) Small single-block path (same tensors as the loss).
    _check_mse(y_raw, y_pred, 4 * 1024 * 1024, 1e-5)

    # 2) Multi-block + 2-core split + partial/duplicated-block masking
    #    (999 rows, block_rows=112 -> 9 blocks over a (2,5) grid).
    xa = jax.random.normal(k4, (999, 128), dtype=jnp.float32)
    xb = jax.random.normal(k5, (999, 128), dtype=jnp.float32)
    _check_mse(xa, xb, 112 * 128 * 4, 1e-5)

    # 3) bf16 inputs (dtype-aware block rows, in-kernel f32 upcast).
    ba = xa[:256].astype(jnp.bfloat16)
    bb = xb[:256].astype(jnp.bfloat16)
    _check_mse(ba, bb, 16 * 1024, 1e-4)

    # 4) Ragged numel (lane tail folded into a tiny jnp sum) + masked last rows.
    ra = jax.random.normal(k4, (2, 3, 17, 19), dtype=jnp.float32)
    rb = jax.random.normal(k5, (2, 3, 17, 19), dtype=jnp.float32)
    _check_mse(ra, rb, 4 * 1024 * 1024, 1e-5)

    print("KERNEL_OK")
</pallas_src>

<mosaic_0001>
module attributes {stable_mosaic.version = 11 : i64} {
  func.func @_mse_sum_kernel(%arg0: i32, %arg1: i32, %arg2: memref<16x128xf32, #tpu.memory_space<vmem>>, %arg3: memref<16x128xf32, #tpu.memory_space<vmem>>, %arg4: memref<1x8x128xf32, #tpu.memory_space<vmem>>) attributes {dimension_semantics = [#tpu.dimension_semantics<parallel>, #tpu.dimension_semantics<arbitrary>], iteration_bounds = array<i64: 1, 1>, scalar_prefetch = 0 : i64, scratch_operands = 0 : i64, tpu.core_type = #tpu.core_type<tc>, window_params = [{transform_indices = @transform_0, window_bounds = array<i64: 16, 128>}, {transform_indices = @transform_1, window_bounds = array<i64: 16, 128>}, {transform_indices = @transform_2, window_bounds = array<i64: 1, 8, 128>}]} {
    %c0_i32 = arith.constant 0 : i32
    %0 = arith.cmpi eq, %arg1, %c0_i32 : i32
    %1 = arith.extui %0 : i1 to i32
    %c0_i32_0 = arith.constant 0 : i32
    %2 = arith.cmpi ne, %1, %c0_i32_0 : i32
    scf.if %2 {
      %cst_10 = arith.constant 0.000000e+00 : f32
      %15 = vector.broadcast %cst_10 : f32 to vector<8x128xf32>
      %c0_11 = arith.constant 0 : index
      %c0_12 = arith.constant 0 : index
      %c0_13 = arith.constant 0 : index
      %16 = vector.load %arg4[%c0_11, %c0_12, %c0_13] : memref<1x8x128xf32, #tpu.memory_space<vmem>>, vector<1x8x128xf32>
      %17 = vector.shape_cast %16 : vector<1x8x128xf32> to vector<8x128xf32>
      %18 = vector.shape_cast %15 : vector<8x128xf32> to vector<1x8x128xf32>
      tpu.vector_store %arg4[%c0_11, %c0_12, %c0_13], %18 {strides = array<i32>} : memref<1x8x128xf32, #tpu.memory_space<vmem>>, vector<1x8x128xf32>,
    } else {
    }
    %c0 = arith.constant 0 : index
    %c0_1 = arith.constant 0 : index
    %3 = vector.load %arg2[%c0, %c0_1] : memref<16x128xf32, #tpu.memory_space<vmem>>, vector<16x128xf32>
    %c0_2 = arith.constant 0 : index
    %c0_3 = arith.constant 0 : index
    %4 = vector.load %arg3[%c0_2, %c0_3] : memref<16x128xf32, #tpu.memory_space<vmem>>, vector<16x128xf32>
    %5 = arith.subf %3, %4 : vector<16x128xf32>
    %6 = arith.mulf %5, %5 : vector<16x128xf32>
    %c0_4 = arith.constant 0 : index
    %c0_5 = arith.constant 0 : index
    %c0_6 = arith.constant 0 : index
    %7 = vector.load %arg4[%c0_4, %c0_5, %c0_6] : memref<1x8x128xf32, #tpu.memory_space<vmem>>, vector<1x8x128xf32>
    %8 = vector.shape_cast %7 : vector<1x8x128xf32> to vector<8x128xf32>
    %9 = vector.shape_cast %6 : vector<16x128xf32> to vector<2x8x128xf32>
    %cst = arith.constant dense<0.000000e+00> : vector<8x128xf32>
    %10 = vector.multi_reduction <add>, %9, %cst [0] : vector<2x8x128xf32> to vector<8x128xf32>
    %11 = arith.addf %8, %10 : vector<8x128xf32>
    %c0_7 = arith.constant 0 : index
    %c0_8 = arith.constant 0 : index
    %c0_9 = arith.constant 0 : index
    %12 = vector.load %arg4[%c0_7, %c0_8, %c0_9] : memref<1x8x128xf32, #tpu.memory_space<vmem>>, vector<1x8x128xf32>
    %13 = vector.shape_cast %12 : vector<1x8x128xf32> to vector<8x128xf32>
    %14 = vector.shape_cast %11 : vector<8x128xf32> to vector<1x8x128xf32>
    tpu.vector_store %arg4[%c0_7, %c0_8, %c0_9], %14 {strides = array<i32>} : memref<1x8x128xf32, #tpu.memory_space<vmem>>, vector<1x8x128xf32>,
    return
  }
  func.func @transform_0(%arg0: i32, %arg1: i32) -> (i32, i32) {
    %c1_i32 = arith.constant 1 : i32
    %0 = arith.muli %arg0, %c1_i32 : i32
    %1 = arith.addi %0, %arg1 : i32
    %c0_i32 = arith.constant 0 : i32
    %2 = arith.minsi %1, %c0_i32 : i32
    %c0_i32_0 = arith.constant 0 : i32
    %c0_i32_1 = arith.constant 0 : i32
    return %2, %c0_i32_0 : i32, i32
  }
  func.func @transform_1(%arg0: i32, %arg1: i32) -> (i32, i32) {
    %c1_i32 = arith.constant 1 : i32
    %0 = arith.muli %arg0, %c1_i32 : i32
    %1 = arith.addi %0, %arg1 : i32
    %c0_i32 = arith.constant 0 : i32
    %2 = arith.minsi %1, %c0_i32 : i32
    %c0_i32_0 = arith.constant 0 : i32
    %c0_i32_1 = arith.constant 0 : i32
    return %2, %c0_i32_0 : i32, i32
  }
  func.func @transform_2(%arg0: i32, %arg1: i32) -> (i32, i32, i32) {
    %c0_i32 = arith.constant 0 : i32
    %c0_i32_0 = arith.constant 0 : i32
    %c0_i32_1 = arith.constant 0 : i32
    return %arg0, %c0_i32, %c0_i32_0 : i32, i32, i32
  }
}

</mosaic_0001>

<bundles_post_ra>
// kernel: tpu_custom_call.1
= control target key start
LH: loop header
LB: loop body
LE: loop exit
PB: predicated region body
PF: predicated region fallthrough
CT: control target
= control target key end

     0   :  { %7 = vsyncpa [#allocation3], 0  ;;  %s198_s0 = inlined_call_operand.hbm [shape: f32[16,128], index: 0, kind: input, shape index: {}]   ;;  %s199_s1 = inlined_call_operand.hbm [shape: f32[16,128], index: 1, kind: input, shape index: {}]   ;;  %s200_s2 = inlined_call_operand.hbm [shape: f32[1,8,128], index: 2, kind: output, shape index: {}]  }
   0x1   :  { %8 = vsyncpa [#allocation6], 0 }
   0x2   :  { %9 = vsyncpa [#allocation4], 0  ;;  %s169_s9 = smov [#allocation2]  }
   0x3   :  { %s21_s10 = sshll.u32 %s169_s9, 4  ;;  %s22_s10 = int_to_ptr.vmem [resolvable:$true] %s21_s10 }
   0x4   :  { %s111_s11 = scalar_lea.vmem %s22_s10, 256  ;;  %p116_p1 = scmp.lt.s32.totalorder %s22_s10, %s22_s10 }
   0x5   :  { %p112_p0 = scmp.ne.s32.totalorder %s22_s10, %s111_s11  ;;  %p117_p2 = scmp.lt.s32.totalorder %s111_s11, %s111_s11 }
   0x7   :  { %p118_p3 = por %p117_p2, %p116_p1 }
   0x9   :  { %p119_p4 = pnand %p118_p3, %p112_p0 }
   0xb   :  { %122 = shalt.err (!%p119_p4)
}
   0xc   :  { %s170_s12 = smov 128   ;;  %s171_s13 = smov 8  }
   0xd   :  { %27 = dma.hbm_to_vmem [thread:$0]  %s198_s0, 256, %s22_s10, [#allocation3], %s170_s12, %s170_s12, %s171_s13  }
   0xe   :  { %s172_s16 = smov [#allocation5]  }
   0xf   :  { %s39_s17 = sshll.u32 %s172_s16, 4  ;;  %s40_s17 = int_to_ptr.vmem [resolvable:$true] %s39_s17 }
  0x10   :  { %s131_s18 = scalar_lea.vmem %s40_s17, 256  ;;  %p136_p6 = scmp.lt.s32.totalorder %s40_s17, %s40_s17 }
  0x11   :  { %p132_p5 = scmp.ne.s32.totalorder %s40_s17, %s131_s18  ;;  %p137_p7 = scmp.lt.s32.totalorder %s131_s18, %s131_s18 }
  0x13   :  { %p138_p8 = por %p137_p7, %p136_p6 }
  0x15   :  { %p139_p9 = pnand %p138_p8, %p132_p5 }
  0x17   :  { %142 = shalt.err (!%p139_p9)
}
  0x18   :  { %45 = dma.hbm_to_vmem [thread:$0]  %s199_s1, 256, %s40_s17, [#allocation6], %s170_s12, %s170_s12, %s171_s13  }
  0x19   :  { %163 = dma.done.wait [#allocation3], 256  }
  0x1a   :  { %164 = vsyncadd [#allocation3], 4294967040 }
  0x1b   :  { %165 = dma.done.wait [#allocation6], 256  }
  0x1c   :  { %166 = vsyncadd [#allocation6], 4294967040  ;;  %v65_v0 = vld [vmem:[#allocation2] sm:$0xff]  ;;  %v66_v1 = vld [vmem:[#allocation2 + $0x8] sm:$0xff]  ;;  %s173_s0 = smov [#allocation7]  }
  0x1d   :  { %v67_v2 = vld [vmem:[#allocation5] sm:$0xff]  ;;  %v68_v3 = vld [vmem:[#allocation5 + $0x8] sm:$0xff]  ;;  %s83_s21 = sshll.u32 %s173_s0, 4  ;;  %s84_s21 = int_to_ptr.vmem [resolvable:$true] %s83_s21 }
  0x1e   :  { %v69_v4 = vsub.f32 %v65_v0, %v67_v2  ;;  %v70_v5 = vsub.f32 %v66_v1, %v68_v3  ;;  %s143_s22 = scalar_lea.vmem %s84_s21, 128  ;;  %p148_p11 = scmp.lt.s32.totalorder %s84_s21, %s84_s21 }
  0x1f   :  { %p144_p10 = scmp.ne.s32.totalorder %s84_s21, %s143_s22  ;;  %p149_p12 = scmp.lt.s32.totalorder %s143_s22, %s143_s22 }
  0x20   :  { %v71_v6 = vmul.f32 %v69_v4, %v69_v4  ;;  %v72_v7 = vmul.f32 %v70_v5, %v70_v5 }
  0x21   :  { %p150_p13 = por %p149_p12, %p148_p11 }
  0x22   :  { %v74_v8 = vadd.f32 %v72_v7, %v71_v6 }
  0x23   :  { %p151_p0 = pnand %p150_p13, %p144_p10 }
  0x24   :  { %76 = vst [vmem:[#allocation7] sm:$0xff] %v74_v8 }
  0x25   :  { %154 = shalt.err (!%p151_p0)
}
  0x26   :  { %86 = dma.vmem_to_hbm [thread:$0]  %s84_s21, 128, %s200_s2, [#allocation4]  }
  0x27   :  { %167 = dma.done.wait [#allocation4], 128  }
  0x28   :  { %168 = vsyncadd [#allocation4], 4294967168 }
  0x29   :  { %90 = vsyncpa [#allocation3], 1 }
  0x2a   :  { %91 = vsyncpa [#allocation6], 1 }
  0x2b   :  { %92 = vsyncpa [#allocation4], 1 }

</bundles_post_ra>
